<compile_context>
chip_gen: v7x
topology: tpu7x:2x2x1
jax: 0.10.0
libtpu: 0.0.40
codegen_flags: <defaults>
</compile_context>

<pallas_src>
import jax
import jax.numpy as jnp
from jax.experimental import pallas as pl
from jax.experimental.pallas import tpu as pltpu

N_EMBD = 32
NUM_HEADS = 4
HEAD_SIZE = 8      # head_size * num_heads == n_embd
BATCH = 2
SEQ = 8            # T <= 20 (size of the tril buffer in the reference)


def _mha_kernel(x_ref, pos_ref, wkq_ref, wv_ref, wp_ref, bp_ref, mask_ref, out_ref):
    # x_ref/pos_ref: (B*T, C) flattened batch+sequence, VMEM resident.
    # wkq_ref/wv_ref: (C, H*hs)  merged per-head K/Q and V projection weights.
    # wp_ref:         (H*hs, C)  output projection (rows in concat/head order).
    # bp_ref:         (1, C)     output projection bias.
    # mask_ref:       (B*T, B*T) additive block-diagonal causal mask (0 / -1e30).
    # out_ref:        (B*T, C).
    hs = HEAD_SIZE
    H = NUM_HEADS

    x = x_ref[...]                                           # (BT, C)
    pe = pos_ref[...]                                        # (BT, C)
    mask = mask_ref[...]                                     # (BT, BT)

    # Two wide projection matmuls (scale already folded into wkq).
    k_all = jnp.dot(x, wkq_ref[...], preferred_element_type=jnp.float32)   # (BT, H*hs)
    v_all = jnp.dot(pe, wv_ref[...], preferred_element_type=jnp.float32)   # (BT, H*hs)

    head_outs = []
    for h in range(H):                                       # static unroll over heads
        kh = k_all[:, h * hs:(h + 1) * hs]                   # (BT, hs) static lane slice
        vh = v_all[:, h * hs:(h + 1) * hs]                   # (BT, hs)
        # scores = kh @ kh^T without materializing a transpose (q == k).
        s = jax.lax.dot_general(kh, kh, (((1,), (1,)), ((), ())),
                                preferred_element_type=jnp.float32)        # (BT, BT)
        s = s + mask
        m = jnp.max(s, axis=-1, keepdims=True)
        p = jnp.exp(s - m)
        inv = pl.reciprocal(jnp.sum(p, axis=-1, keepdims=True), approx=True)
        head_outs.append(jnp.dot(p * inv, vh,
                                 preferred_element_type=jnp.float32))      # (BT, hs)

    o = jnp.concatenate(head_outs, axis=-1)                  # (BT, H*hs)
    # Single fused output projection + bias, single full-block store.
    out_ref[...] = (jnp.dot(o, wp_ref[...], preferred_element_type=jnp.float32)
                    + bp_ref[...]).astype(out_ref.dtype)


def multi_head_attention(pos_emb, x, w_kq, w_v, w_proj, b_proj):
    """pos_emb, x: (B, T, n_embd).
    w_kq, w_v: (H, n_embd, head_size); w_proj: (H, head_size, n_embd); b_proj: (1, n_embd)."""
    B, T, C = x.shape
    H, _, hs = w_kq.shape
    BT = B * T

    # Fold the attention scale into the K/Q weight (q == k, so hs^-0.25 per side),
    # and merge heads along the output dimension: (H, C, hs) -> (C, H*hs).
    scale = jnp.float32(hs) ** jnp.float32(-0.25)
    wkq_all = (w_kq * scale).transpose(1, 0, 2).reshape(C, H * hs)
    wv_all = w_v.transpose(1, 0, 2).reshape(C, H * hs)
    wp_all = w_proj.reshape(H * hs, C)        # rows already in concat(head) order

    # Flatten batch into the sublane axis.
    x2 = x.reshape(BT, C)
    p2 = pos_emb.reshape(BT, C)

    # Block-diagonal causal additive mask over the flattened rows (built once,
    # outside the kernel).
    idx = jnp.arange(BT, dtype=jnp.int32)
    row, col = idx[:, None], idx[None, :]
    keep = ((row // T) == (col // T)) & (col <= row)
    # Large finite negative instead of -inf so padding can never produce NaNs.
    mask = jnp.where(keep, 0.0, -1e30).astype(jnp.float32)

    vmem = pl.BlockSpec(memory_space=pltpu.MemorySpace.VMEM)
    out = pl.pallas_call(
        _mha_kernel,
        out_shape=jax.ShapeDtypeStruct((BT, C), jnp.float32),
        in_specs=[vmem] * 7,
        out_specs=vmem,
    )(x2, p2, wkq_all, wv_all, wp_all, b_proj, mask)
    return out.reshape(B, T, C)


def _reference(pos_emb, x, w_kq, w_v, w_proj, b_proj):
    """Pure-JAX reference mirroring the PyTorch module (eval mode)."""
    B, T, C = x.shape
    causal = jnp.tril(jnp.ones((T, T), bool))
    outs = []
    for h in range(NUM_HEADS):
        k = x @ w_kq[h]                  # (B, T, hs); q == k in the reference module
        v = pos_emb @ w_v[h]
        s = jnp.einsum('btd,bsd->bts', k, k) * (HEAD_SIZE ** -0.5)
        s = jnp.where(causal[None], s, -jnp.inf)
        p = jax.nn.softmax(s, axis=-1)
        outs.append(jnp.einsum('bts,bsd->btd', p, v))
    o = jnp.concatenate(outs, axis=-1)                        # (B, T, H*hs)
    w_proj_t = w_proj.reshape(NUM_HEADS * HEAD_SIZE, N_EMBD)  # rows in concat (head) order
    return o @ w_proj_t + b_proj


if __name__ == "__main__":
    key = jax.random.PRNGKey(0)
    k1, k2, k3, k4, k5, k6 = jax.random.split(key, 6)

    # Deterministic parameter init (shapes from the module's __init__), stored
    # per head and pre-transposed for x @ W:
    #   Head.key_n_query / Head.value: Linear(n_embd, head_size, bias=False)
    #   proj: Linear(head_size*num_heads, n_embd) with bias.
    w_kq = jax.random.normal(k1, (NUM_HEADS, N_EMBD, HEAD_SIZE), jnp.float32) * 0.1
    w_v = jax.random.normal(k2, (NUM_HEADS, N_EMBD, HEAD_SIZE), jnp.float32) * 0.1
    w_proj = jax.random.normal(k3, (NUM_HEADS, HEAD_SIZE, N_EMBD), jnp.float32) * 0.1
    b_proj = jax.random.normal(k4, (1, N_EMBD), jnp.float32) * 0.1

    # Inputs: forward(pos_emb, x), both (B, T, n_embd).
    pos_emb = jax.random.normal(k5, (BATCH, SEQ, N_EMBD), jnp.float32)
    x = jax.random.normal(k6, (BATCH, SEQ, N_EMBD), jnp.float32)

    out = multi_head_attention(pos_emb, x, w_kq, w_v, w_proj, b_proj)
    out = jax.block_until_ready(out)

    ref = _reference(pos_emb, x, w_kq, w_v, w_proj, b_proj)
    assert out.shape == (BATCH, SEQ, N_EMBD)
    # 2e-3 tolerance accommodates pl.reciprocal(approx=True) in the softmax.
    assert jnp.allclose(out, ref, atol=2e-3, rtol=2e-3), "mismatch vs reference"

    print("KERNEL_OK")
</pallas_src>

<mosaic_0001>
module attributes {stable_mosaic.version = 11 : i64} {
  func.func @_mha_kernel(%arg0: memref<16x32xf32, #tpu.memory_space<vmem>>, %arg1: memref<16x32xf32, #tpu.memory_space<vmem>>, %arg2: memref<32x32xf32, #tpu.memory_space<vmem>>, %arg3: memref<32x32xf32, #tpu.memory_space<vmem>>, %arg4: memref<32x32xf32, #tpu.memory_space<vmem>>, %arg5: memref<1x32xf32, #tpu.memory_space<vmem>>, %arg6: memref<16x16xf32, #tpu.memory_space<vmem>>, %arg7: memref<16x32xf32, #tpu.memory_space<vmem>>) attributes {dimension_semantics = [], scalar_prefetch = 0 : i64, scratch_operands = 0 : i64, tpu.core_type = #tpu.core_type<tc>} {
    %c0 = arith.constant 0 : index
    %c0_0 = arith.constant 0 : index
    %0 = vector.load %arg0[%c0, %c0_0] : memref<16x32xf32, #tpu.memory_space<vmem>>, vector<16x32xf32>
    %c0_1 = arith.constant 0 : index
    %c0_2 = arith.constant 0 : index
    %1 = vector.load %arg1[%c0_1, %c0_2] : memref<16x32xf32, #tpu.memory_space<vmem>>, vector<16x32xf32>
    %c0_3 = arith.constant 0 : index
    %c0_4 = arith.constant 0 : index
    %2 = vector.load %arg6[%c0_3, %c0_4] : memref<16x16xf32, #tpu.memory_space<vmem>>, vector<16x16xf32>
    %c0_5 = arith.constant 0 : index
    %c0_6 = arith.constant 0 : index
    %3 = vector.load %arg2[%c0_5, %c0_6] : memref<32x32xf32, #tpu.memory_space<vmem>>, vector<32x32xf32>
    %cst = arith.constant dense<0.000000e+00> : vector<16x32xf32>
    %4 = tpu.matmul %0, %3, %cst {dimension_numbers = #tpu.dot_dimension_numbers<[1], [0], [0], [1], [0, 0, 1, 1], [], []>} : vector<16x32xf32>, vector<32x32xf32>, vector<16x32xf32> -> vector<16x32xf32>
    %c0_7 = arith.constant 0 : index
    %c0_8 = arith.constant 0 : index
    %5 = vector.load %arg3[%c0_7, %c0_8] : memref<32x32xf32, #tpu.memory_space<vmem>>, vector<32x32xf32>
    %cst_9 = arith.constant dense<0.000000e+00> : vector<16x32xf32>
    %6 = tpu.matmul %1, %5, %cst_9 {dimension_numbers = #tpu.dot_dimension_numbers<[1], [0], [0], [1], [0, 0, 1, 1], [], []>} : vector<16x32xf32>, vector<32x32xf32>, vector<16x32xf32> -> vector<16x32xf32>
    %7 = vector.extract_strided_slice %4 {offsets = [0, 0], sizes = [16, 8], strides = [1, 1]} : vector<16x32xf32> to vector<16x8xf32>
    %8 = vector.extract_strided_slice %6 {offsets = [0, 0], sizes = [16, 8], strides = [1, 1]} : vector<16x32xf32> to vector<16x8xf32>
    %cst_10 = arith.constant dense<0.000000e+00> : vector<16x16xf32>
    %9 = tpu.matmul %7, %7, %cst_10 {dimension_numbers = #tpu.dot_dimension_numbers<[1], [1], [0], [0], [0, 0, 1, 0], [], []>} : vector<16x8xf32>, vector<16x8xf32>, vector<16x16xf32> -> vector<16x16xf32>
    %10 = arith.addf %9, %2 : vector<16x16xf32>
    %cst_11 = arith.constant dense<0xFF800000> : vector<16xf32>
    %11 = vector.multi_reduction <maximumf>, %10, %cst_11 [1] : vector<16x16xf32> to vector<16xf32>
    %12 = vector.shape_cast %11 : vector<16xf32> to vector<16x1xf32>
    %13 = vector.broadcast %12 : vector<16x1xf32> to vector<16x16xf32>
    %14 = arith.subf %10, %13 : vector<16x16xf32>
    %15 = math.exp %14 : vector<16x16xf32>
    %cst_12 = arith.constant dense<0.000000e+00> : vector<16xf32>
    %16 = vector.multi_reduction <add>, %15, %cst_12 [1] : vector<16x16xf32> to vector<16xf32>
    %17 = vector.shape_cast %16 : vector<16xf32> to vector<16x1xf32>
    %18 = tpu.reciprocal %17 {approx = true} : vector<16x1xf32> -> vector<16x1xf32>
    %19 = vector.broadcast %18 : vector<16x1xf32> to vector<16x16xf32>
    %20 = arith.mulf %15, %19 : vector<16x16xf32>
    %cst_13 = arith.constant dense<0.000000e+00> : vector<16x8xf32>
    %21 = tpu.matmul %20, %8, %cst_13 {dimension_numbers = #tpu.dot_dimension_numbers<[1], [0], [0], [1], [0, 0, 1, 1], [], []>} : vector<16x16xf32>, vector<16x8xf32>, vector<16x8xf32> -> vector<16x8xf32>
    %22 = vector.extract_strided_slice %4 {offsets = [0, 8], sizes = [16, 8], strides = [1, 1]} : vector<16x32xf32> to vector<16x8xf32>
    %23 = vector.extract_strided_slice %6 {offsets = [0, 8], sizes = [16, 8], strides = [1, 1]} : vector<16x32xf32> to vector<16x8xf32>
    %cst_14 = arith.constant dense<0.000000e+00> : vector<16x16xf32>
    %24 = tpu.matmul %22, %22, %cst_14 {dimension_numbers = #tpu.dot_dimension_numbers<[1], [1], [0], [0], [0, 0, 1, 0], [], []>} : vector<16x8xf32>, vector<16x8xf32>, vector<16x16xf32> -> vector<16x16xf32>
    %25 = arith.addf %24, %2 : vector<16x16xf32>
    %cst_15 = arith.constant dense<0xFF800000> : vector<16xf32>
    %26 = vector.multi_reduction <maximumf>, %25, %cst_15 [1] : vector<16x16xf32> to vector<16xf32>
    %27 = vector.shape_cast %26 : vector<16xf32> to vector<16x1xf32>
    %28 = vector.broadcast %27 : vector<16x1xf32> to vector<16x16xf32>
    %29 = arith.subf %25, %28 : vector<16x16xf32>
    %30 = math.exp %29 : vector<16x16xf32>
    %cst_16 = arith.constant dense<0.000000e+00> : vector<16xf32>
    %31 = vector.multi_reduction <add>, %30, %cst_16 [1] : vector<16x16xf32> to vector<16xf32>
    %32 = vector.shape_cast %31 : vector<16xf32> to vector<16x1xf32>
    %33 = tpu.reciprocal %32 {approx = true} : vector<16x1xf32> -> vector<16x1xf32>
    %34 = vector.broadcast %33 : vector<16x1xf32> to vector<16x16xf32>
    %35 = arith.mulf %30, %34 : vector<16x16xf32>
    %cst_17 = arith.constant dense<0.000000e+00> : vector<16x8xf32>
    %36 = tpu.matmul %35, %23, %cst_17 {dimension_numbers = #tpu.dot_dimension_numbers<[1], [0], [0], [1], [0, 0, 1, 1], [], []>} : vector<16x16xf32>, vector<16x8xf32>, vector<16x8xf32> -> vector<16x8xf32>
    %37 = vector.extract_strided_slice %4 {offsets = [0, 16], sizes = [16, 8], strides = [1, 1]} : vector<16x32xf32> to vector<16x8xf32>
    %38 = vector.extract_strided_slice %6 {offsets = [0, 16], sizes = [16, 8], strides = [1, 1]} : vector<16x32xf32> to vector<16x8xf32>
    %cst_18 = arith.constant dense<0.000000e+00> : vector<16x16xf32>
    %39 = tpu.matmul %37, %37, %cst_18 {dimension_numbers = #tpu.dot_dimension_numbers<[1], [1], [0], [0], [0, 0, 1, 0], [], []>} : vector<16x8xf32>, vector<16x8xf32>, vector<16x16xf32> -> vector<16x16xf32>
    %40 = arith.addf %39, %2 : vector<16x16xf32>
    %cst_19 = arith.constant dense<0xFF800000> : vector<16xf32>
    %41 = vector.multi_reduction <maximumf>, %40, %cst_19 [1] : vector<16x16xf32> to vector<16xf32>
    %42 = vector.shape_cast %41 : vector<16xf32> to vector<16x1xf32>
    %43 = vector.broadcast %42 : vector<16x1xf32> to vector<16x16xf32>
    %44 = arith.subf %40, %43 : vector<16x16xf32>
    %45 = math.exp %44 : vector<16x16xf32>
    %cst_20 = arith.constant dense<0.000000e+00> : vector<16xf32>
    %46 = vector.multi_reduction <add>, %45, %cst_20 [1] : vector<16x16xf32> to vector<16xf32>
    %47 = vector.shape_cast %46 : vector<16xf32> to vector<16x1xf32>
    %48 = tpu.reciprocal %47 {approx = true} : vector<16x1xf32> -> vector<16x1xf32>
    %49 = vector.broadcast %48 : vector<16x1xf32> to vector<16x16xf32>
    %50 = arith.mulf %45, %49 : vector<16x16xf32>
    %cst_21 = arith.constant dense<0.000000e+00> : vector<16x8xf32>
    %51 = tpu.matmul %50, %38, %cst_21 {dimension_numbers = #tpu.dot_dimension_numbers<[1], [0], [0], [1], [0, 0, 1, 1], [], []>} : vector<16x16xf32>, vector<16x8xf32>, vector<16x8xf32> -> vector<16x8xf32>
    %52 = vector.extract_strided_slice %4 {offsets = [0, 24], sizes = [16, 8], strides = [1, 1]} : vector<16x32xf32> to vector<16x8xf32>
    %53 = vector.extract_strided_slice %6 {offsets = [0, 24], sizes = [16, 8], strides = [1, 1]} : vector<16x32xf32> to vector<16x8xf32>
    %cst_22 = arith.constant dense<0.000000e+00> : vector<16x16xf32>
    %54 = tpu.matmul %52, %52, %cst_22 {dimension_numbers = #tpu.dot_dimension_numbers<[1], [1], [0], [0], [0, 0, 1, 0], [], []>} : vector<16x8xf32>, vector<16x8xf32>, vector<16x16xf32> -> vector<16x16xf32>
    %55 = arith.addf %54, %2 : vector<16x16xf32>
    %cst_23 = arith.constant dense<0xFF800000> : vector<16xf32>
    %56 = vector.multi_reduction <maximumf>, %55, %cst_23 [1] : vector<16x16xf32> to vector<16xf32>
    %57 = vector.shape_cast %56 : vector<16xf32> to vector<16x1xf32>
    %58 = vector.broadcast %57 : vector<16x1xf32> to vector<16x16xf32>
    %59 = arith.subf %55, %58 : vector<16x16xf32>
    %60 = math.exp %59 : vector<16x16xf32>
    %cst_24 = arith.constant dense<0.000000e+00> : vector<16xf32>
    %61 = vector.multi_reduction <add>, %60, %cst_24 [1] : vector<16x16xf32> to vector<16xf32>
    %62 = vector.shape_cast %61 : vector<16xf32> to vector<16x1xf32>
    %63 = tpu.reciprocal %62 {approx = true} : vector<16x1xf32> -> vector<16x1xf32>
    %64 = vector.broadcast %63 : vector<16x1xf32> to vector<16x16xf32>
    %65 = arith.mulf %60, %64 : vector<16x16xf32>
    %cst_25 = arith.constant dense<0.000000e+00> : vector<16x8xf32>
    %66 = tpu.matmul %65, %53, %cst_25 {dimension_numbers = #tpu.dot_dimension_numbers<[1], [0], [0], [1], [0, 0, 1, 1], [], []>} : vector<16x16xf32>, vector<16x8xf32>, vector<16x8xf32> -> vector<16x8xf32>
    %67 = tpu.concatenate %21, %36, %51, %66 in 1 : vector<16x8xf32>, vector<16x8xf32>, vector<16x8xf32>, vector<16x8xf32> -> vector<16x32xf32>
    %c0_26 = arith.constant 0 : index
    %c0_27 = arith.constant 0 : index
    %68 = vector.load %arg4[%c0_26, %c0_27] : memref<32x32xf32, #tpu.memory_space<vmem>>, vector<32x32xf32>
    %cst_28 = arith.constant dense<0.000000e+00> : vector<16x32xf32>
    %69 = tpu.matmul %67, %68, %cst_28 {dimension_numbers = #tpu.dot_dimension_numbers<[1], [0], [0], [1], [0, 0, 1, 1], [], []>} : vector<16x32xf32>, vector<32x32xf32>, vector<16x32xf32> -> vector<16x32xf32>
    %c0_29 = arith.constant 0 : index
    %c0_30 = arith.constant 0 : index
    %70 = vector.load %arg5[%c0_29, %c0_30] : memref<1x32xf32, #tpu.memory_space<vmem>>, vector<1x32xf32>
    %71 = vector.broadcast %70 : vector<1x32xf32> to vector<16x32xf32>
    %72 = arith.addf %69, %71 : vector<16x32xf32>
    %c0_31 = arith.constant 0 : index
    %c0_32 = arith.constant 0 : index
    %73 = vector.load %arg7[%c0_31, %c0_32] : memref<16x32xf32, #tpu.memory_space<vmem>>, vector<16x32xf32>
    tpu.vector_store %arg7[%c0_31, %c0_32], %72 {strides = array<i32>} : memref<16x32xf32, #tpu.memory_space<vmem>>, vector<16x32xf32>,
    return
  }
}

</mosaic_0001>

<bundles_post_ra>
// kernel: tpu_custom_call.1
= control target key start
LH: loop header
LB: loop body
LE: loop exit
PB: predicated region body
PF: predicated region fallthrough
CT: control target
= control target key end

     0   :  { %12 = vsyncpa [#allocation3], 0  ;;  %s1894_s0 = inlined_call_operand.hbm [shape: f32[16,32], index: 0, kind: input, shape index: {}]   ;;  %s1895_s1 = inlined_call_operand.hbm [shape: f32[16,32], index: 1, kind: input, shape index: {}]   ;;  %s1896_s2 = inlined_call_operand.hbm [shape: f32[32,32], index: 2, kind: input, shape index: {}]   ;;  %s1897_s3 = inlined_call_operand.hbm [shape: f32[32,32], index: 3, kind: input, shape index: {}]   ;;  %s1898_s4 = inlined_call_operand.hbm [shape: f32[32,32], index: 4, kind: input, shape index: {}]   ;;  %s1899_s5 = inlined_call_operand.vmem [shape: f32[1,32], index: 5, kind: input, shape index: {}]   ;;  %s1900_s6 = inlined_call_operand.vmem [shape: f32[16,16], index: 6, kind: input, shape index: {}]   ;;  %s1901_s7 = inlined_call_operand.hbm [shape: f32[16,32], index: 7, kind: output, shape index: {}]  }
   0x1   :  { %13 = vsyncpa [#allocation6], 0 }
   0x2   :  { %14 = vsyncpa [#allocation9], 0 }
   0x3   :  { %15 = vsyncpa [#allocation4], 0  ;;  %s1614_s24 = smov [#allocation5]   ;;  %s1615_s26 = smov [#allocation8]  }
   0x4   :  { %s33_s25 = sshll.u32 %s1614_s24, 4  ;;  %s57_s27 = sshll.u32 %s1615_s26, 4  ;;  %s34_s25 = int_to_ptr.vmem [resolvable:$true] %s33_s25  ;;  %s1667_s27 = int_to_ptr.vmem [resolvable:$true] %s57_s27 }
   0x5   :  { %s1474_s30 = scalar_lea.hbm %s1895_s1, 256 }
   0x6   :  { %p1475_p0 = scmp.ne.s32.totalorder %s1895_s1, %s1474_s30  ;;  %p1478_p1 = scmp.lt.u32.totalorder %s1474_s30, %s1895_s1 }
   0x8   :  { %p1480_p2 = pnand %p1478_p1, %p1475_p0 }
   0xa   :  { %1483 = shalt.err (!%p1480_p2)
}
   0xb   :  { %s1484_s12 = scalar_lea.vmem %s34_s25, 256  ;;  %p1489_p4 = scmp.lt.s32.totalorder %s34_s25, %s34_s25 }
   0xc   :  { %p1485_p3 = scmp.ne.s32.totalorder %s34_s25, %s1484_s12  ;;  %p1490_p5 = scmp.lt.s32.totalorder %s1484_s12, %s1484_s12 }
   0xe   :  { %p1491_p6 = por %p1490_p5, %p1489_p4 }
  0x10   :  { %p1492_p7 = pnand %p1491_p6, %p1485_p3 }
  0x12   :  { %1495 = shalt.err (!%p1492_p7)
}
  0x13   :  { %s1616_s13 = smov 128   ;;  %s1617_s14 = smov 8  }
  0x14   :  { %39 = dma.hbm_to_vmem [thread:$0]  %s1895_s1, 256, %s34_s25, [#allocation6], %s1616_s13, %s1616_s13, %s1617_s14  }
  0x15   :  { %s1496_s19 = scalar_lea.hbm %s1897_s3, 512 }
  0x16   :  { %p1497_p8 = scmp.ne.s32.totalorder %s1897_s3, %s1496_s19  ;;  %p1500_p9 = scmp.lt.u32.totalorder %s1496_s19, %s1897_s3 }
  0x18   :  { %p1502_p10 = pnand %p1500_p9, %p1497_p8 }
  0x1a   :  { %1505 = shalt.err (!%p1502_p10)
}
  0x1b   :  { %s1506_s24 = scalar_lea.vmem %s1667_s27, 512  ;;  %p1511_p12 = scmp.lt.s32.totalorder %s1667_s27, %s1667_s27 }
  0x1c   :  { %p1507_p11 = scmp.ne.s32.totalorder %s1667_s27, %s1506_s24  ;;  %p1512_p13 = scmp.lt.s32.totalorder %s1506_s24, %s1506_s24 }
  0x1e   :  { %p1513_p0 = por %p1512_p13, %p1511_p12 }
  0x20   :  { %p1514_p1 = pnand %p1513_p0, %p1507_p11 }
  0x22   :  { %1517 = shalt.err (!%p1514_p1)
}
  0x23   :  { %63 = dma.hbm_to_vmem [thread:$0]  %s1897_s3, 512, %s1667_s27, [#allocation9], %s1616_s13, %s1616_s13, %s1617_s14  }
  0x24   :  { %s1618_s26 = smov [#allocation2]   ;;  %s1619_s29 = smov [#allocation7]  }
  0x25   :  { %s21_s28 = sshll.u32 %s1618_s26, 4  ;;  %s45_s30 = sshll.u32 %s1619_s29, 4  ;;  %s22_s28 = int_to_ptr.vmem [resolvable:$true] %s21_s28  ;;  %s1704_s30 = int_to_ptr.vmem [resolvable:$true] %s45_s30 }
  0x26   :  { %s1518_s10 = scalar_lea.hbm %s1894_s0, 256 }
  0x27   :  { %p1519_p2 = scmp.ne.s32.totalorder %s1894_s0, %s1518_s10  ;;  %p1522_p3 = scmp.lt.u32.totalorder %s1518_s10, %s1894_s0 }
  0x29   :  { %p1524_p4 = pnand %p1522_p3, %p1519_p2 }
  0x2b   :  { %1527 = shalt.err (!%p1524_p4)
}
  0x2c   :  { %s1528_s3 = scalar_lea.vmem %s22_s28, 256  ;;  %p1533_p6 = scmp.lt.s32.totalorder %s22_s28, %s22_s28 }
  0x2d   :  { %p1529_p5 = scmp.ne.s32.totalorder %s22_s28, %s1528_s3  ;;  %p1534_p7 = scmp.lt.s32.totalorder %s1528_s3, %s1528_s3 }
  0x2f   :  { %p1535_p8 = por %p1534_p7, %p1533_p6 }
  0x31   :  { %p1536_p9 = pnand %p1535_p8, %p1529_p5 }
  0x33   :  { %1539 = shalt.err (!%p1536_p9)
}
  0x34   :  { %27 = dma.hbm_to_vmem [thread:$0]  %s1894_s0, 256, %s22_s28, [#allocation3], %s1616_s13, %s1616_s13, %s1617_s14  }
  0x35   :  { %s1540_s20 = scalar_lea.hbm %s1896_s2, 512 }
  0x36   :  { %p1541_p10 = scmp.ne.s32.totalorder %s1896_s2, %s1540_s20  ;;  %p1544_p11 = scmp.lt.u32.totalorder %s1540_s20, %s1896_s2 }
  0x38   :  { %p1546_p12 = pnand %p1544_p11, %p1541_p10 }
  0x3a   :  { %1549 = shalt.err (!%p1546_p12)
}
  0x3b   :  { %s1550_s1 = scalar_lea.vmem %s1704_s30, 512  ;;  %p1555_p0 = scmp.lt.s32.totalorder %s1704_s30, %s1704_s30 }
  0x3c   :  { %p1551_p13 = scmp.ne.s32.totalorder %s1704_s30, %s1550_s1  ;;  %p1556_p1 = scmp.lt.s32.totalorder %s1550_s1, %s1550_s1 }
  0x3e   :  { %p1557_p2 = por %p1556_p1, %p1555_p0 }
  0x40   :  { %p1558_p3 = pnand %p1557_p2, %p1551_p13 }
  0x42   :  { %1561 = shalt.err (!%p1558_p3)
}
  0x43   :  { %51 = dma.hbm_to_vmem [thread:$0]  %s1896_s2, 512, %s1704_s30, [#allocation6], %s1616_s13, %s1616_s13, %s1617_s14  }
  0x44   :  { %s1620_s26 = smov [#allocation10]   ;;  %s1562_s9 = scalar_lea.hbm %s1898_s4, 512 }
  0x45   :  { %s69_s28 = sshll.u32 %s1620_s26, 4  ;;  %p1563_p4 = scmp.ne.s32.totalorder %s1898_s4, %s1562_s9  ;;  %s70_s28 = int_to_ptr.vmem [resolvable:$true] %s69_s28 }
  0x46   :  { %p1566_p5 = scmp.lt.u32.totalorder %s1562_s9, %s1898_s4 }
  0x48   :  { %p1568_p6 = pnand %p1566_p5, %p1563_p4 }
  0x4a   :  { %1571 = shalt.err (!%p1568_p6)
}
  0x4b   :  { %s1572_s16 = scalar_lea.vmem %s70_s28, 512  ;;  %p1577_p8 = scmp.lt.s32.totalorder %s70_s28, %s70_s28 }
  0x4c   :  { %p1573_p7 = scmp.ne.s32.totalorder %s70_s28, %s1572_s16  ;;  %p1578_p9 = scmp.lt.s32.totalorder %s1572_s16, %s1572_s16 }
  0x4e   :  { %p1579_p10 = por %p1578_p9, %p1577_p8 }
  0x50   :  { %p1580_p11 = pnand %p1579_p10, %p1573_p7 }
  0x52   :  { %1583 = shalt.err (!%p1580_p11)
}
  0x53   :  { %75 = dma.hbm_to_vmem [thread:$0]  %s1898_s4, 512, %s70_s28, [#allocation9], %s1616_s13, %s1616_s13, %s1617_s14  }
  0x54   :  { %1606 = dma.done.wait [#allocation3], 256  }
  0x55   :  { %1607 = vsyncadd [#allocation3], 4294967040 }
  0x56   :  { %1608 = dma.done.wait [#allocation6], 768  }
  0x57   :  { %1609 = vsyncadd [#allocation6], 4294966528 }
  0x58   :  { %1610 = dma.done.wait [#allocation9], 1024  }
  0x59   :  { %1611 = vsyncadd [#allocation9], 4294966272  ;;  %vm105_vm0 = vcmask 261120   ;;  %v101_v0 = vld [vmem:[#allocation7] sm:$0xff]  ;;  %v102_v1 = vld [vmem:[#allocation7 + $0x8] sm:$0xff]  ;;  %vm272_vm1 = vcmask 64512  }
  0x5a   :  { %v103_v2 = vld [vmem:[#allocation7 + $0x10] sm:$0xff]  ;;  %v1350_v3 = vpack.c.bf16 %v102_v1, %v101_v0  ;;  %v104_v4 = vld [vmem:[#allocation7 + $0x18] sm:$0xff]  ;;  %v95_v5 = vld [vmem:[#allocation2] sm:$0xff]  ;;  %s1621_s4 = smov 120   ;;  %s1622_s3 = smov 112   ;;  %vm354_vm3 = vcmask 130048  }
  0x5b   :  { %v1354_v6 = vpack.c.bf16 %v104_v4, %v103_v2  ;;  %1269 = vmatprep.mubr.msk.f32.mxu0 %vm105_vm0, %v95_v5  ;;  %v96_v7 = vld [vmem:[#allocation2 + $0x8] sm:$0xff]  ;;  %v187_v8 = vld [vmem:[#allocation8] sm:$0xff]  ;;  %v189_v10 = vld [vmem:[#allocation8 + $0x10] sm:$0xff]  ;;  %s1624_s20 = smov 16   ;;  %s1625_s21 = smov 24   ;;  %vm1064_vm4 = vcmask 195584  }
  0x5c   :  { %1351 = vmatprep.subr.bf16.mxu0 %v1350_v3  ;;  %v188_v9 = vld [vmem:[#allocation8 + $0x8] sm:$0xff]  ;;  %v190_v12 = vld [vmem:[#allocation8 + $0x18] sm:$0xff]  ;;  %v97_v13 = vld [vmem:[#allocation5] sm:$0xff]  ;;  %s1626_s24 = smov [#allocation11]  }
  0x5d   :  { %1353 = vmatpush3.bf16.msra.mxu0 %v1350_v3  ;;  %v1358_v11 = vpack.c.bf16 %v188_v9, %v187_v8  ;;  %v1362_v14 = vpack.c.bf16 %v190_v12, %v189_v10  ;;  %1280 = vmatprep.mubr.msk.f32.mxu1 %vm105_vm0, %v97_v13  ;;  %v98_v16 = vld [vmem:[#allocation5 + $0x8] sm:$0xff]  ;;  %vm1767_vm2 = vmpackc.low %vm272_vm1, %vm272_vm1  ;;  %v1788_v22 = vld [vmem:[%s1900_s6] sm:$0xff]  ;;  %s1166_s1 = sshll.u32 %s1626_s24, 4  ;;  %s1167_s1 = int_to_ptr.vmem [resolvable:$true] %s1166_s1 }
  0x5e   :  { %1355 = vmatprep.subr.bf16.mxu0 %v1354_v6  ;;  %v1793_v24 = vld [vmem:[%s1900_s6 + $0x8] sm:$0xff]  ;;  %s1623_s6 = smov 104   ;;  %s1584_s0 = scalar_lea.vmem %s1167_s1, 256 }
  0x5f   :  { %1359 = vmatprep.subr.bf16.mxu1 %v1358_v11  ;;  %p1585_p12 = scmp.ne.s32.totalorder %s1167_s1, %s1584_s0  ;;  %p1589_p13 = scmp.lt.s32.totalorder %s1167_s1, %s1167_s1 }
  0x60   :  { %1361 = vmatpush3.bf16.msra.mxu1 %v1358_v11  ;;  %p1590_p0 = scmp.lt.s32.totalorder %s1584_s0, %s1584_s0 }
  0x61   :  { %1357 = vmatpush3.bf16.msra.mxu0 %v1354_v6  ;;  %1363 = vmatprep.subr.bf16.mxu1 %v1362_v14 }
  0x62   :  { %p1591_p1 = por %p1590_p0, %p1589_p13 }
  0x64   :  { %1270 = vmatmul.mubr.msk.f32.vlgmr.msra.gmra.mrb[0].mxu0 %vm105_vm0, %v96_v7  ;;  %1365 = vmatpush3.bf16.msra.mxu1 %v1362_v14  ;;  %p1592_p2 = pnand %p1591_p1, %p1585_p12 }
  0x67   :  { %1281 = vmatmul.mubr.msk.f32.vlgmr.msra.gmra.mrb[0].mxu1 %vm105_vm0, %v98_v16 }
 0x137   :  { %v1759_v15 = vpop.f32.mrb[0].mxu0 }
 0x138   :  { %460 = vrot.lane.b32.xlu1 %v1759_v15, %s1621_s4  ;;  %v1763_v17 = vpop.f32.mrb[1].mxu0 }
 0x139   :  { %1287 = vmatprep.mubr.msk.f32.mxu0 %vm272_vm1, %v1763_v17  ;;  %v1366_v19 = vpack.c.bf16 %v1759_v15, %v1763_v17 }
 0x13a   :  { %v1282_v30 = vpop.f32.mrb[0].mxu1 }
 0x13b   :  { %1368 = vmatprep.subr.msk.bf16.mxu0 %vm1767_vm2, %v1366_v19  ;;  %v263_v31 = vpop.f32.mrb[1].mxu1 }
 0x13c   :  { %652 = vrot.lane.b32.xlu1 %v1763_v17, %s1622_s3  ;;  %1371 = vmatpush3.bf16.xpose.msk.msra.mxu0 %vm1767_vm2, %v1366_v19  ;;  %v1372_v32 = vpack.c.bf16 %v1282_v30, %v263_v31  ;;  %v1805_v45 = vpack.i.bf16 %v1282_v30, %v263_v31 }
 0x13e   :  { %1373 = vmatprep.subr.bf16.mxu1 %v1372_v32 }
 0x13f   :  { %1375 = vmatpush3.bf16.msra.mxu1 %v1372_v32 }
 0x143   :  { %1288 = vmatmul.mubr.msk.f32.vlgmr.msra.gmra.mrb[2].mxu0 %vm272_vm1, %v1759_v15 }
 0x1aa   :  { %v461_v20 = vpop.permute.xlu1 %460 }
 0x1ae   :  { %v653_v21 = vpop.permute.xlu1 %652 }
 0x1af   :  { %1315 = vmatprep.mubr.msk.f32.mxu0 %vm272_vm1, %v653_v21 }
 0x216   :  { %v1289_v23 = vpop.f32.mrb[2].mxu0 }
 0x217   :  { %v345_v25 = vpop.f32.mrb[3].mxu0  ;;  %v351_v27 = vadd.f32 %v1289_v23, %v1793_v24 }
 0x218   :  { %v346_v26 = vadd.f32 %v345_v25, %v1788_v22 }
 0x219   :  { %v358_v29 = vsel %vm354_vm3, %v351_v27, -inf }
 0x21a   :  { %v355_v28 = vsel %vm354_vm3, %v346_v26, -inf }
 0x21b   :  { %356 = vmax.xlane.f32.xlu0 %v355_v28 }
 0x21f   :  { %359 = vmax.xlane.f32.xlu0 %v358_v29 }
 0x235   :  { %458 = vrot.lane.b32.xlu0 %v1763_v17, %s1621_s4 }
 0x2a8   :  { %v357_v33 = vpop.xlane.xlu0 %356 }
 0x2a9   :  { %v361_v34 = vsub.f32 %v346_v26, %v357_v33 }
 0x2ab   :  { %v363_v37 = vmul.f32 1.442695, %v361_v34 }
 0x2ac   :  { %v360_v35 = vpop.xlane.xlu0 %359 }
 0x2ad   :  { %v362_v36 = vsub.f32 %v351_v27, %v360_v35 }
 0x2af   :  { %v365_v38 = vmul.f32 1.442695, %v362_v36 }
 0x2b0   :  { %v459_v39 = vpop.permute.xlu0 %458 }
 0x2b1   :  { %1442 = vpow2.f32 %v365_v38  ;;  %v1376_v40 = vpack.c.bf16 %v461_v20, %v459_v39 }
 0x2b2   :  { %1444 = vpow2.f32 %v363_v37 }
 0x2b3   :  { %1378 = vmatprep.subr.msk.bf16.mxu1 %vm1767_vm2, %v1376_v40 }
 0x2bb   :  { %v1443_v41 = vpop.eup %1442 }
 0x2bc   :  { %v370_v42 = vsel %vm354_vm3, %v1443_v41, 0.0  ;;  %v1445_v43 = vpop.eup %1444 }
 0x2bd   :  { %371 = vadd.xlane.f32.xlu1 %v370_v42  ;;  %v367_v44 = vsel %vm354_vm3, %v1445_v43, 0.0 }
 0x2c1   :  { %368 = vadd.xlane.f32.xlu1 %v367_v44 }
 0x2d2   :  { %654 = vrot.lane.b32.xlu1 %v1759_v15, %s1622_s3 }
 0x34a   :  { %v372_v46 = vpop.xlane.xlu1 %371 }
 0x34b   :  { %1446 = vrcp.f32 %v372_v46 }
 0x34e   :  { %v369_v47 = vpop.xlane.xlu1 %368 }
 0x34f   :  { %1448 = vrcp.f32 %v369_v47 }
 0x352   :  { %v655_v48 = vpop.permute.xlu1 %654 }
 0x353   :  { %v1386_v49 = vpack.c.bf16 %v655_v48, %v653_v21 }
 0x355   :  { %1388 = vmatprep.subr.msk.bf16.mxu0 %vm1767_vm2, %v1386_v49  ;;  %v1447_v50 = vpop.eup %1446 }
 0x356   :  { %1391 = vmatpush3.bf16.xpose.msk.msra.mxu0 %vm1767_vm2, %v1386_v49  ;;  %v376_v53 = vmul.f32 %v1447_v50, %v1443_v41 }
 0x359   :  { %v1449_v51 = vpop.eup %1448 }
 0x35a   :  { %v375_v52 = vmul.f32 %v1449_v51, %v1445_v43 }
 0x35c   :  { %1294 = vmatprep.mubr.msk.f32.mxu1 %vm354_vm3, %v375_v52 }
 0x35d   :  { %1295 = vmatmul.mubr.msk.f32.vlgmr.msra.gmra.mrb[2].mxu1 %vm354_vm3, %v376_v53  ;;  %1316 = vmatmul.mubr.msk.f32.vlgmr.msra.gmra.mrb[4].mxu0 %vm272_vm1, %v655_v48 }
 0x35e   :  { %1381 = vmatpush3.bf16.xpose.msk.msra.mxu1 %vm1767_vm2, %v1376_v40  ;;  %1301 = vmatprep.mubr.msk.f32.mxu1 %vm272_vm1, %v459_v39 }
 0x365   :  { %1302 = vmatmul.mubr.msk.f32.vlgmr.msra.gmra.mrb[4].mxu1 %vm272_vm1, %v461_v20 }
 0x430   :  { %v1820_v54 = vpop.f32.mrb[2].mxu1  ;;  %v1317_v55 = vpop.f32.mrb[4].mxu0 }
 0x431   :  { %v1822_v56 = vpop.f32.mrb[3].mxu1  ;;  %v726_v57 = vpop.f32.mrb[5].mxu0  ;;  %v732_v1 = vadd.f32 %v1317_v55, %v1793_v24 }
 0x432   :  { %v727_v63 = vadd.f32 %v726_v57, %v1788_v22 }
 0x433   :  { %v738_v3 = vsel %vm354_vm3, %v732_v1, -inf }
 0x434   :  { %v735_v2 = vsel %vm354_vm3, %v727_v63, -inf }
 0x438   :  { %v1303_v58 = vpop.f32.mrb[4].mxu1 }
 0x439   :  { %v538_v59 = vadd.f32 %v1303_v58, %v1793_v24  ;;  %v532_v60 = vpop.f32.mrb[5].mxu1 }
 0x43a   :  { %v533_v61 = vadd.f32 %v532_v60, %v1788_v22 }
 0x43b   :  { %v544_v62 = vsel %vm354_vm3, %v538_v59, -inf }
 0x43c   :  { %545 = vmax.xlane.f32.xlu1 %v544_v62  ;;  %v541_v0 = vsel %vm354_vm3, %v533_v61, -inf }
 0x43d   :  { %542 = vmax.xlane.f32.xlu0 %v541_v0 }
 0x441   :  { %736 = vmax.xlane.f32.xlu0 %v735_v2 }
 0x445   :  { %739 = vmax.xlane.f32.xlu0 %v738_v3 }
 0x4c9   :  { %v546_v6 = vpop.xlane.xlu1 %545 }
 0x4ca   :  { %v543_v4 = vpop.xlane.xlu0 %542  ;;  %v548_v9 = vsub.f32 %v538_v59, %v546_v6 }
 0x4cb   :  { %v547_v5 = vsub.f32 %v533_v61, %v543_v4 }
 0x4cc   :  { %v551_v14 = vmul.f32 1.442695, %v548_v9 }
 0x4cd   :  { %v549_v10 = vmul.f32 1.442695, %v547_v5 }
 0x4ce   :  { %v737_v7 = vpop.xlane.xlu0 %736 }
 0x4cf   :  { %v741_v8 = vsub.f32 %v727_v63, %v737_v7 }
 0x4d1   :  { %v743_v11 = vmul.f32 1.442695, %v741_v8 }
 0x4d2   :  { %v740_v12 = vpop.xlane.xlu0 %739 }
 0x4d3   :  { %1450 = vpow2.f32 %v743_v11  ;;  %v742_v13 = vsub.f32 %v732_v1, %v740_v12 }
 0x4d4   :  { %1452 = vpow2.f32 %v549_v10 }
 0x4d5   :  { %v745_v16 = vmul.f32 1.442695, %v742_v13 }
 0x4d7   :  { %1454 = vpow2.f32 %v745_v16 }
 0x4d8   :  { %1456 = vpow2.f32 %v551_v14 }
 0x4dd   :  { %v1451_v19 = vpop.eup %1450 }
 0x4de   :  { %v747_v20 = vsel %vm354_vm3, %v1451_v19, 0.0  ;;  %v1453_v21 = vpop.eup %1452 }
 0x4df   :  { %748 = vadd.xlane.f32.xlu0 %v747_v20  ;;  %v553_v25 = vsel %vm354_vm3, %v1453_v21, 0.0  ;;  %v1069_v20 = vld [vmem:[#allocation10 + $0x10] sm:$0xff] }
 0x4e1   :  { %v1455_v23 = vpop.eup %1454 }
 0x4e2   :  { %v750_v26 = vsel %vm354_vm3, %v1455_v23, 0.0  ;;  %v1457_v27 = vpop.eup %1456 }
 0x4e3   :  { %554 = vadd.xlane.f32.xlu0 %v553_v25  ;;  %751 = vadd.xlane.f32.xlu1 %v750_v26  ;;  %v556_v28 = vsel %vm354_vm3, %v1457_v27, 0.0 }
 0x4e7   :  { %557 = vadd.xlane.f32.xlu1 %v556_v28 }
 0x4f8   :  { %1433 = vrot.lane.b32.xlu1 %v1805_v45, %s1622_s3 }
 0x4f9   :  { %1428 = vrot.lane.b32.xlu0 %v1805_v45, %s1621_s4 }
 0x4fc   :  { %844 = vrot.lane.b32.xlu1 %v1763_v17, %s1623_s6 }
 0x500   :  { %846 = vrot.lane.b32.xlu1 %v1759_v15, %s1623_s6 }
 0x56c   :  { %v749_v29 = vpop.xlane.xlu0 %748 }
 0x570   :  { %v752_v30 = vpop.xlane.xlu1 %751  ;;  %v555_v31 = vpop.xlane.xlu0 %554 }
 0x571   :  { %1458 = vrcp.f32 %v555_v31 }
 0x572   :  { %1460 = vrcp.f32 %v749_v29 }
 0x574   :  { %v558_v32 = vpop.xlane.xlu1 %557  ;;  %v1429_v33 = vpop.permute.xlu0 %1428 }
 0x575   :  { %1462 = vrcp.f32 %v558_v32  ;;  %v1431_v34 = vunpack.i.h.bf16 %v1429_v33  ;;  %v1430_v35 = vunpack.i.l.bf16 %v1429_v33 }
 0x576   :  { %1464 = vrcp.f32 %v752_v30 }
 0x577   :  { %v1382_v36 = vpack.c.bf16 %v1431_v34, %v1430_v35 }
 0x578   :  { %v1434_v37 = vpop.permute.xlu1 %1433 }
 0x579   :  { %v1436_v38 = vunpack.i.h.bf16 %v1434_v37  ;;  %v1435_v39 = vunpack.i.l.bf16 %v1434_v37  ;;  %1383 = vmatprep.subr.bf16.mxu1 %v1382_v36 }
 0x57a   :  { %1385 = vmatpush3.bf16.msra.mxu1 %v1382_v36 }
 0x57b   :  { %v1392_v17 = vpack.c.bf16 %v1436_v38, %v1435_v39  ;;  %v1459_v40 = vpop.eup %1458 }
 0x57c   :  { %v845_v15 = vpop.permute.xlu1 %844  ;;  %v561_v41 = vmul.f32 %v1459_v40, %v1453_v21  ;;  %v1461_v42 = vpop.eup %1460 }
 0x57d   :  { %1393 = vmatprep.subr.bf16.mxu1 %v1392_v17  ;;  %v755_v49 = vmul.f32 %v1461_v42, %v1451_v19  ;;  %v1068_v19 = vld [vmem:[#allocation10 + $0x8] sm:$0xff] }
 0x57e   :  { %1308 = vmatprep.mubr.msk.f32.mxu1 %vm354_vm3, %v561_v41 }
 0x57f   :  { %v1463_v43 = vpop.eup %1462 }
 0x580   :  { %v562_v44 = vmul.f32 %v1463_v43, %v1457_v27  ;;  %v847_v46 = vpop.permute.xlu1 %846  ;;  %v1465_v47 = vpop.eup %1464 }
 0x581   :  { %v1396_v48 = vpack.c.bf16 %v847_v46, %v845_v15  ;;  %v756_v50 = vmul.f32 %v1465_v47, %v1455_v23  ;;  %v1070_v23 = vld [vmem:[#allocation10 + $0x18] sm:$0xff] }
 0x582   :  { %1309 = vmatmul.mubr.msk.f32.vlgmr.msra.gmra.mrb[6].mxu1 %vm354_vm3, %v562_v44  ;;  %v1410_v25 = vpack.c.bf16 %v1070_v23, %v1069_v20 }
 0x583   :  { %1395 = vmatpush3.bf16.msra.mxu1 %v1392_v17  ;;  %1322 = vmatprep.mubr.msk.f32.mxu1 %vm354_vm3, %v755_v49  ;;  %v1208_v17 = vld [vmem:[%s1899_s5] ss:$0 sm:$0xff] }
 0x584   :  { %1398 = vmatprep.subr.msk.bf16.mxu1 %vm1767_vm2, %v1396_v48 }
 0x586   :  { %1323 = vmatmul.mubr.msk.f32.vlgmr.msra.gmra.mrb[8].mxu1 %vm354_vm3, %v756_v50 }
 0x587   :  { %1329 = vmatprep.mubr.msk.f32.mxu1 %vm272_vm1, %v845_v15 }
 0x58c   :  { %1401 = vmatpush3.bf16.xpose.msk.msra.mxu1 %vm1767_vm2, %v1396_v48 }
 0x593   :  { %1330 = vmatmul.mubr.msk.f32.vlgmr.msra.gmra.mrb[10].mxu1 %vm272_vm1, %v847_v46 }
 0x655   :  { %v1310_v51 = vpop.f32.mrb[6].mxu1 }
 0x656   :  { %v643_v52 = vpop.f32.mrb[7].mxu1 }
 0x659   :  { %v1324_v53 = vpop.f32.mrb[8].mxu1 }
 0x65a   :  { %v835_v55 = vpop.f32.mrb[9].mxu1 }
 0x666   :  { %v1331_v57 = vpop.f32.mrb[10].mxu1 }
 0x667   :  { %v924_v58 = vadd.f32 %v1331_v57, %v1793_v24  ;;  %v918_v59 = vpop.f32.mrb[11].mxu1 }
 0x668   :  { %v919_v60 = vadd.f32 %v918_v59, %v1788_v22 }
 0x669   :  { %v930_v61 = vsel %vm354_vm3, %v924_v58, -inf }
 0x66a   :  { %931 = vmax.xlane.f32.xlu1 %v930_v61  ;;  %v927_v62 = vsel %vm354_vm3, %v919_v60, -inf }
 0x66b   :  { %928 = vmax.xlane.f32.xlu0 %v927_v62 }
 0x67b   :  { %1038 = vrot.lane.b32.xlu1 %v643_v52, %s1617_s14 }
 0x67f   :  { %1040 = vrot.lane.b32.xlu1 %v1310_v51, %s1617_s14 }
 0x683   :  { %1046 = vrot.lane.b32.xlu1 %v835_v55, %s1624_s20 }
 0x6f7   :  { %v932_v18 = vpop.xlane.xlu1 %931 }
 0x6f8   :  { %v934_v63 = vsub.f32 %v924_v58, %v932_v18  ;;  %v929_v0 = vpop.xlane.xlu0 %928 }
 0x6f9   :  { %v933_v1 = vsub.f32 %v919_v60, %v929_v0 }
 0x6fa   :  { %v937_v24 = vmul.f32 1.442695, %v934_v63 }
 0x6fb   :  { %v935_v2 = vmul.f32 1.442695, %v933_v1  ;;  %v1039_v28 = vpop.permute.xlu1 %1038 }
 0x6fc   :  { %1466 = vpow2.f32 %v937_v24  ;;  %v1060_v32 = vsel %vm272_vm1, %v1822_v56, %v1039_v28 }
 0x6fd   :  { %1468 = vpow2.f32 %v935_v2 }
 0x6ff   :  { %v1041_v29 = vpop.permute.xlu1 %1040 }
 0x700   :  { %v1061_v34 = vsel %vm272_vm1, %v1820_v54, %v1041_v29 }
 0x703   :  { %v1047_v31 = vpop.permute.xlu1 %1046 }
 0x704   :  { %v1062_v35 = vsel %vm354_vm3, %v1060_v32, %v1047_v31 }
 0x706   :  { %v1467_v22 = vpop.eup %1466 }
 0x707   :  { %v942_v3 = vsel %vm354_vm3, %v1467_v22, 0.0  ;;  %v1469_v4 = vpop.eup %1468 }
 0x708   :  { %943 = vadd.xlane.f32.xlu0 %v942_v3  ;;  %v939_v5 = vsel %vm354_vm3, %v1469_v4, 0.0 }
 0x70c   :  { %940 = vadd.xlane.f32.xlu0 %v939_v5 }
 0x722   :  { %1438 = vrot.lane.b32.xlu0 %v1805_v45, %s1623_s6  ;;  %v1067_v45 = vld [vmem:[#allocation10] sm:$0xff] }
 0x723   :  { %v1406_v21 = vpack.c.bf16 %v1068_v19, %v1067_v45 }
 0x726   :  { %1048 = vrot.lane.b32.xlu0 %v1324_v53, %s1624_s20 }
 0x795   :  { %v944_v6 = vpop.xlane.xlu0 %943 }
 0x796   :  { %1470 = vrcp.f32 %v944_v6 }
 0x799   :  { %v941_v7 = vpop.xlane.xlu0 %940 }
 0x79a   :  { %1472 = vrcp.f32 %v941_v7 }
 0x79d   :  { %v1439_v8 = vpop.permute.xlu0 %1438 }
 0x79e   :  { %v1441_v9 = vunpack.i.h.bf16 %v1439_v8  ;;  %v1440_v10 = vunpack.i.l.bf16 %v1439_v8 }
 0x7a0   :  { %v1402_v11 = vpack.c.bf16 %v1441_v9, %v1440_v10  ;;  %v1471_v12 = vpop.eup %1470 }
 0x7a1   :  { %v948_v16 = vmul.f32 %v1471_v12, %v1467_v22  ;;  %v1049_v30 = vpop.permute.xlu0 %1048 }
 0x7a2   :  { %1403 = vmatprep.subr.bf16.mxu0 %v1402_v11  ;;  %v1063_v37 = vsel %vm354_vm3, %v1061_v34, %v1049_v30 }
 0x7a3   :  { %1405 = vmatpush3.bf16.msra.mxu0 %v1402_v11 }
 0x7a4   :  { %v1473_v13 = vpop.eup %1472  ;;  %1407 = vmatprep.subr.bf16.mxu0 %v1406_v21 }
 0x7a5   :  { %v947_v14 = vmul.f32 %v1473_v13, %v1469_v4 }
 0x7a7   :  { %1336 = vmatprep.mubr.msk.f32.mxu0 %vm354_vm3, %v947_v14 }
 0x7a8   :  { %1337 = vmatmul.mubr.msk.f32.vlgmr.msra.gmra.mrb[6].mxu0 %vm354_vm3, %v948_v16 }
 0x7a9   :  { %1409 = vmatpush3.bf16.msra.mxu0 %v1406_v21 }
 0x7aa   :  { %1411 = vmatprep.subr.bf16.mxu0 %v1410_v25 }
 0x7ad   :  { %1413 = vmatpush3.bf16.msra.mxu0 %v1410_v25 }
 0x87b   :  { %v1338_v26 = vpop.f32.mrb[6].mxu0 }
 0x87c   :  { %1056 = vrot.lane.b32.xlu0 %v1338_v26, %s1625_s21  ;;  %v1027_v27 = vpop.f32.mrb[7].mxu0 }
 0x87d   :  { %1054 = vrot.lane.b32.xlu1 %v1027_v27, %s1625_s21 }
 0x8ee   :  { %v1057_v33 = vpop.permute.xlu0 %1056 }
 0x8ef   :  { %v1055_v36 = vpop.permute.xlu1 %1054  ;;  %v1066_v39 = vsel %vm1064_vm4, %v1063_v37, %v1057_v33 }
 0x8f0   :  { %v1065_v38 = vsel %vm1064_vm4, %v1062_v35, %v1055_v36 }
 0x8f1   :  { %1347 = vmatprep.mubr.msk.f32.mxu0 %vm105_vm0, %v1065_v38 }
 0x8f2   :  { %1348 = vmatmul.mubr.msk.f32.vlgmr.msra.gmra.mrb[8].mxu0 %vm105_vm0, %v1066_v39 }
 0x9c5   :  { %v1349_v56 = vpop.f32.mrb[8].mxu0 }
 0x9c6   :  { %v1156_v40 = vadd.f32 %v1349_v56, %v1208_v17  ;;  %v1150_v54 = vpop.f32.mrb[9].mxu0 }
 0x9c7   :  { %v1151_v15 = vadd.f32 %v1208_v17, %v1150_v54 }
 0x9c8   :  { %1160 = vst.msk [vmem:[#allocation11 + $0x8] sm:$0xff] %vm105_vm0, %v1156_v40 }
 0x9c9   :  { %1159 = vst.msk [vmem:[#allocation11] sm:$0xff] %vm105_vm0, %v1151_v15 }
 0x9ca   :  { %1595 = shalt.err (!%p1592_p2)
}
 0x9cb   :  { %s1596_s26 = scalar_lea.hbm %s1901_s7, 256 }
 0x9cc   :  { %p1597_p3 = scmp.ne.s32.totalorder %s1901_s7, %s1596_s26  ;;  %p1600_p4 = scmp.lt.u32.totalorder %s1596_s26, %s1901_s7 }
 0x9ce   :  { %p1602_p5 = pnand %p1600_p4, %p1597_p3 }
 0x9d0   :  { %1605 = shalt.err (!%p1602_p5)
}
 0x9d1   :  { %1172 = dma.vmem_to_hbm [thread:$0]  %s1167_s1, 256, %s1901_s7, [#allocation4], %s1616_s13, %s1616_s13, %s1617_s14  }
 0x9d2   :  { %1612 = dma.done.wait [#allocation4], 256  }
 0x9d3   :  { %1613 = vsyncadd [#allocation4], 4294967040 }
 0x9d4   :  { %1176 = vsyncpa [#allocation3], 1 }
 0x9d5   :  { %1177 = vsyncpa [#allocation6], 1 }
 0x9d6   :  { %1178 = vsyncpa [#allocation9], 1 }
 0x9d7   :  { %1179 = vsyncpa [#allocation4], 1 }

</bundles_post_ra>
